<compile_context>
chip_gen: v7x
topology: tpu7x:2x2x1
jax: 0.10.0
libtpu: 0.0.40
codegen_flags: <defaults>
</compile_context>

<pallas_src>
import functools

import jax
import jax.numpy as jnp
from jax.experimental import pallas as pl
from jax.experimental.pallas import tpu as pltpu


def _round_up(x, m):
    return (x + m - 1) // m * m


def _hard_sign(v):
    one = jnp.ones_like(v)
    return jnp.where(v > 0, one, jnp.where(v < 0, -one, jnp.zeros_like(v)))


# ----------------------------------------------------------------------------
# Kernel 1: weight binarization (hoisted out of the matmul loop), f32 -> bf16
# ----------------------------------------------------------------------------
def _make_prep_kernel(mode_w):
    def kernel(kk_ref, w_ref, o_ref):
        w = w_ref[...].astype(jnp.float32)
        if mode_w == "soft":
            wb = jnp.tanh(kk_ref[0] * w)
        elif mode_w == "hard":
            wb = _hard_sign(w)          # VPU compare/select; zeros stay zero
        else:                            # "none": pass-through
            wb = w
        o_ref[...] = wb.astype(o_ref.dtype)
    return kernel


# ----------------------------------------------------------------------------
# Kernel 2: tiled matmul with in-kernel activation binarization + f32 accumulator
# ----------------------------------------------------------------------------
def _make_bin_matmul_kernel(mode_a):
    def kernel(ka_ref, x_ref, wb_ref, o_ref, acc_ref):
        @pl.when(pl.program_id(2) == 0)
        def _init():
            acc_ref[...] = jnp.zeros_like(acc_ref)

        x = x_ref[...].astype(jnp.float32)
        if mode_a == "soft":
            xb = jnp.tanh(ka_ref[0] * x)
        elif mode_a == "hard":
            xb = _hard_sign(x)
        else:                            # "none": pass-through
            xb = x

        acc_ref[...] += jnp.dot(
            xb.astype(jnp.bfloat16), wb_ref[...],
            preferred_element_type=jnp.float32)

        @pl.when(pl.program_id(2) == pl.num_programs(2) - 1)
        def _store():
            o_ref[...] = acc_ref[...].astype(o_ref.dtype)
    return kernel


# ----------------------------------------------------------------------------
# Host wrapper: padding, tiling, pallas_call plumbing
# ----------------------------------------------------------------------------
def bin_linear(x, w, *, ka, kk, mode_a, mode_w):
    """y = binA(x) @ binW(w); x: (B, In), w: (In, Out)."""
    B, In = x.shape
    In2, Out = w.shape
    assert In == In2

    # Generation-friendly tile sizes: lane dims multiples of 128, sublane of 8.
    tm = min(256, _round_up(B, 8))
    tn = min(256, _round_up(Out, 128))
    tk = min(512, _round_up(In, 128))
    Mp = _round_up(B, tm)
    Np = _round_up(Out, tn)
    Kp = _round_up(In, tk)

    xp = jnp.pad(x.astype(jnp.float32), ((0, Mp - B), (0, Kp - In)))
    wp = jnp.pad(w.astype(jnp.float32), ((0, Kp - In), (0, Np - Out)))

    # --- weight binarization, once per forward (bf16 output halves DMA bytes) ---
    kk_arr = jnp.array([kk], dtype=jnp.float32)
    w_bin = pl.pallas_call(
        _make_prep_kernel(mode_w),
        out_shape=jax.ShapeDtypeStruct((Kp, Np), jnp.bfloat16),
        grid=(Kp // tk, Np // tn),
        in_specs=[
            pl.BlockSpec((1,), lambda i, j: (0,),
                         memory_space=pltpu.MemorySpace.SMEM),
            pl.BlockSpec((tk, tn), lambda i, j: (i, j)),
        ],
        out_specs=pl.BlockSpec((tk, tn), lambda i, j: (i, j)),
        compiler_params=pltpu.CompilerParams(
            dimension_semantics=("parallel", "parallel")),
        cost_estimate=pl.CostEstimate(
            flops=Kp * Np,
            transcendentals=(Kp * Np if mode_w == "soft" else 0),
            bytes_accessed=Kp * Np * (4 + 2)),
    )(kk_arr, wp)

    # --- tiled (M, N, K) matmul with f32 VMEM accumulator ---
    ka_arr = jnp.array([ka], dtype=jnp.float32)
    flops = 2 * Mp * Np * Kp
    transc = Mp * Kp if mode_a == "soft" else 0
    bytes_accessed = Mp * Kp * 4 + Kp * Np * 2 + Mp * Np * 4

    out = pl.pallas_call(
        _make_bin_matmul_kernel(mode_a),
        out_shape=jax.ShapeDtypeStruct((Mp, Np), jnp.float32),
        grid=(Mp // tm, Np // tn, Kp // tk),
        in_specs=[
            pl.BlockSpec((1,), lambda i, j, k: (0,),
                         memory_space=pltpu.MemorySpace.SMEM),
            pl.BlockSpec((tm, tk), lambda i, j, k: (i, k)),
            pl.BlockSpec((tk, tn), lambda i, j, k: (k, j)),
        ],
        out_specs=pl.BlockSpec((tm, tn), lambda i, j, k: (i, j)),
        scratch_shapes=[pltpu.VMEM((tm, tn), jnp.float32)],
        compiler_params=pltpu.CompilerParams(
            dimension_semantics=("parallel", "parallel", "arbitrary"),
            vmem_limit_bytes=32 * 1024 * 1024),
        cost_estimate=pl.CostEstimate(
            flops=flops, transcendentals=transc, bytes_accessed=bytes_accessed),
    )(ka_arr, xp, w_bin)

    return out[:B, :Out]


# ----------------------------------------------------------------------------
# JAX-side reproduction of the Base module's state machinery
# ----------------------------------------------------------------------------
class BaseBinLinear:
    """JAX/Pallas equivalent of CV.modules.base.Base with a concrete
    binarized-linear forward.  Mirrors set_kk/set_ka/get_kk/get_ka/
    toBin/quitBin semantics exactly."""

    BIG = 10000000.0  # hard-binarization steepness used by toBin()

    def __init__(self, weight, binW=True, binA=True, kk=10.0, ka=10.0):
        self.binW = binW
        self.binA = binA
        self.weight = weight          # (In, Out)
        self.kk = float(kk)
        self.ka = float(ka)
        self._kknow = None
        self._kanow = None
        self._state = "N"

    # ---- kk / ka accessors (mirror the PyTorch module) ----
    def set_kk(self, kka):
        if not self.binW:
            raise NotImplementedError
        self.kk = float(kka)

    def set_ka(self, kka):
        if not self.binA:
            raise NotImplementedError
        self.ka = float(kka)

    def get_kk(self):
        if not self.binW:
            raise NotImplementedError
        return self.kk

    def get_ka(self):
        if not self.binA:
            raise NotImplementedError
        return self.ka

    def toBin(self):
        assert self._state == "N", "already binary"
        if self.binW:
            self._kknow = self.get_kk()
            self.set_kk(self.BIG)
        if self.binA:
            self._kanow = self.get_ka()
            self.set_ka(self.BIG)
        self._state = "B"
        return (self._kknow, self._kanow)

    def quitBin(self):
        assert self._state == "B", "not binary"
        if self.binW:
            self.set_kk(self._kknow)
        if self.binA:
            self.set_ka(self._kanow)
        self._state = "N"

    # ---- forward (the Pallas hot path) ----
    def forward(self, x):
        if self.binA:
            mode_a = "hard" if self.ka >= self.BIG else "soft"
            ka = self.ka
        else:
            mode_a, ka = "none", 1.0   # pass-through (fixed vs. previous version)
        if self.binW:
            mode_w = "hard" if self.kk >= self.BIG else "soft"
            kk = self.kk
        else:
            mode_w, kk = "none", 1.0   # pass-through
        return bin_linear(x, self.weight, ka=ka, kk=kk,
                          mode_a=mode_a, mode_w=mode_w)

    __call__ = forward


# ----------------------------------------------------------------------------
# main
# ----------------------------------------------------------------------------
if __name__ == "__main__":
    key = jax.random.PRNGKey(0)
    kx, kw = jax.random.split(key)

    B, In, Out = 8, 32, 32
    x = jax.random.normal(kx, (B, In), dtype=jnp.float32)
    w = jax.random.normal(kw, (In, Out), dtype=jnp.float32) * 0.1

    hp = jax.lax.Precision.HIGHEST
    q = lambda a: a.astype(jnp.bfloat16).astype(jnp.float32)  # bf16 quantization

    mod = BaseBinLinear(w, binW=True, binA=True, kk=10.0, ka=10.0)

    # Normal ("soft") mode: y = tanh(ka*x) @ tanh(kk*w), bf16 MXU inputs
    y_soft = mod(x)
    jax.block_until_ready(y_soft)
    y_soft_ref = jnp.dot(q(jnp.tanh(10.0 * x)), q(jnp.tanh(10.0 * w)), precision=hp)
    assert y_soft.shape == (B, Out)
    assert jnp.allclose(y_soft, y_soft_ref, atol=1e-3, rtol=1e-3)

    # Hard binary mode via toBin(): kk = ka = 1e7  ->  sign() path (VPU selects)
    mod.toBin()
    y_bin = mod(x)
    jax.block_until_ready(y_bin)
    y_bin_ref = jnp.dot(jnp.sign(x), jnp.sign(w), precision=hp)
    assert jnp.allclose(y_bin, y_bin_ref, atol=1e-3, rtol=1e-3)

    # quitBin restores the soft steepness
    mod.quitBin()
    assert mod.get_kk() == 10.0 and mod.get_ka() == 10.0

    # binA=False: activations pass through unbinarized (fixed path)
    mod_nb = BaseBinLinear(w, binW=True, binA=False, kk=10.0, ka=10.0)
    y_nb = mod_nb(x)
    jax.block_until_ready(y_nb)
    y_nb_ref = jnp.dot(q(x), q(jnp.tanh(10.0 * w)), precision=hp)
    assert jnp.allclose(y_nb, y_nb_ref, atol=1e-2, rtol=1e-2)

    print("KERNEL_OK")
</pallas_src>

<mosaic_0001>
module attributes {stable_mosaic.version = 11 : i64} {
  func.func @kernel(%arg0: i32, %arg1: i32, %arg2: memref<1xf32, #tpu.memory_space<smem>>, %arg3: memref<128x128xf32, #tpu.memory_space<vmem>>, %arg4: memref<128x128xbf16, #tpu.memory_space<vmem>>) attributes {dimension_semantics = [#tpu.dimension_semantics<parallel>, #tpu.dimension_semantics<parallel>], iteration_bounds = array<i64: 1, 1>, scalar_prefetch = 0 : i64, scratch_operands = 0 : i64, tpu.core_type = #tpu.core_type<tc>, window_params = [{transform_indices = @transform_0, window_bounds = array<i64: 1>}, {transform_indices = @transform_1, window_bounds = array<i64: 128, 128>}, {transform_indices = @transform_2, window_bounds = array<i64: 128, 128>}]} {
    %c0 = arith.constant 0 : index
    %c0_0 = arith.constant 0 : index
    %0 = vector.load %arg3[%c0, %c0_0] : memref<128x128xf32, #tpu.memory_space<vmem>>, vector<128x128xf32>
    %c0_1 = arith.constant 0 : index
    %1 = memref.load %arg2[%c0_1] : memref<1xf32, #tpu.memory_space<smem>>
    %2 = vector.broadcast %1 : f32 to vector<128x128xf32>
    %3 = arith.mulf %2, %0 : vector<128x128xf32>
    %4 = math.tanh %3 : vector<128x128xf32>
    %5 = arith.truncf %4 : vector<128x128xf32> to vector<128x128xbf16>
    %c0_2 = arith.constant 0 : index
    %c0_3 = arith.constant 0 : index
    %6 = vector.load %arg4[%c0_2, %c0_3] : memref<128x128xbf16, #tpu.memory_space<vmem>>, vector<128x128xbf16>
    tpu.vector_store %arg4[%c0_2, %c0_3], %5 {strides = array<i32>} : memref<128x128xbf16, #tpu.memory_space<vmem>>, vector<128x128xbf16>,
    return
  }
  func.func @transform_0(%arg0: i32, %arg1: i32) -> i32 {
    %c0_i32 = arith.constant 0 : i32
    %c0_i32_0 = arith.constant 0 : i32
    return %c0_i32 : i32
  }
  func.func @transform_1(%arg0: i32, %arg1: i32) -> (i32, i32) {
    %c0_i32 = arith.constant 0 : i32
    return %arg0, %arg1 : i32, i32
  }
  func.func @transform_2(%arg0: i32, %arg1: i32) -> (i32, i32) {
    %c0_i32 = arith.constant 0 : i32
    return %arg0, %arg1 : i32, i32
  }
}

</mosaic_0001>

<bundles_post_ra>
// kernel: tpu_custom_call.1
= control target key start
LH: loop header
LB: loop body
LE: loop exit
PB: predicated region body
PF: predicated region fallthrough
CT: control target
= control target key end

     0   :  { %8 = vsyncpa [#allocation4], 0  ;;  %s387_s0 = inlined_call_operand.<no memory space> [shape: f32[1], index: 0, kind: input, shape index: {}]   ;;  %s388_s1 = inlined_call_operand.hbm [shape: f32[128,128], index: 1, kind: input, shape index: {}]   ;;  %s389_s2 = inlined_call_operand.hbm [shape: bf16[128,128], index: 2, kind: output, shape index: {}]  }
   0x1   :  { %9 = vsyncpa [#allocation5], 0  ;;  %s339_s9 = smov [#allocation3]   ;;  %s291_s13 = scalar_lea.hbm %s388_s1, 2048 }
   0x2   :  { %s17_s10 = sshll.u32 %s339_s9, 4  ;;  %p292_p0 = scmp.ne.s32.totalorder %s388_s1, %s291_s13  ;;  %s18_s10 = int_to_ptr.vmem [resolvable:$true] %s17_s10 }
   0x3   :  { %p295_p1 = scmp.lt.u32.totalorder %s291_s13, %s388_s1 }
   0x5   :  { %p297_p2 = pnand %p295_p1, %p292_p0 }
   0x7   :  { %300 = shalt.err (!%p297_p2)
}
   0x8   :  { %s301_s18 = scalar_lea.vmem %s18_s10, 2048  ;;  %p306_p4 = scmp.lt.s32.totalorder %s18_s10, %s18_s10 }
   0x9   :  { %p302_p3 = scmp.ne.s32.totalorder %s18_s10, %s301_s18  ;;  %p307_p5 = scmp.lt.s32.totalorder %s301_s18, %s301_s18 }
   0xb   :  { %p308_p6 = por %p307_p5, %p306_p4 }
   0xd   :  { %p309_p7 = pnand %p308_p6, %p302_p3 }
   0xf   :  { %312 = shalt.err (!%p309_p7)
}
  0x10   :  { %s340_s19 = smov 128   ;;  %s341_s20 = smov 8  }
  0x11   :  { %23 = dma.hbm_to_vmem [thread:$0]  %s388_s1, 2048, %s18_s10, [#allocation4], %s340_s19, %s340_s19, %s341_s20  }
  0x12   :  { %335 = dma.done.wait [#allocation4], 2048  }
  0x13   :  { %336 = vsyncadd [#allocation4], 4294965248  ;;  %v44_v0 = vstv %s387_s0  ;;  %v27_v1 = vld [vmem:[#allocation3] sm:$0xff]  ;;  %v28_v2 = vld [vmem:[#allocation3 + $0x8] sm:$0xff]  ;;  %s342_s0 = smov [#allocation6]  }
  0x14   :  { %v29_v3 = vld [vmem:[#allocation3 + $0x10] sm:$0xff]  ;;  %v45_v4 = vmul.f32 %v44_v0, %v27_v1  ;;  %v46_v5 = vmul.f32 %v44_v0, %v28_v2  ;;  %v30_v6 = vld [vmem:[#allocation3 + $0x18] sm:$0xff]  ;;  %v31_v8 = vld [vmem:[#allocation3 + $0x20] sm:$0xff]  ;;  %s162_s1 = sshll.u32 %s342_s0, 4  ;;  %s163_s1 = int_to_ptr.vmem [resolvable:$true] %s162_s1 }
  0x15   :  { %v47_v7 = vmul.f32 %v44_v0, %v29_v3  ;;  %v32_v9 = vld [vmem:[#allocation3 + $0x28] sm:$0xff]  ;;  %v48_v10 = vmul.f32 %v44_v0, %v30_v6  ;;  %v33_v11 = vld [vmem:[#allocation3 + $0x30] sm:$0xff]  ;;  %v49_v12 = vmul.f32 %v44_v0, %v31_v8  ;;  %v34_v13 = vld [vmem:[#allocation3 + $0x38] sm:$0xff]  ;;  %s313_s25 = scalar_lea.vmem %s163_s1, 1024  ;;  %p318_p9 = scmp.lt.s32.totalorder %s163_s1, %s163_s1 }
  0x16   :  { %259 = vtanh.f32 %v45_v4  ;;  %v50_v14 = vmul.f32 %v44_v0, %v32_v9  ;;  %v35_v15 = vld [vmem:[#allocation3 + $0x40] sm:$0xff]  ;;  %v51_v16 = vmul.f32 %v44_v0, %v33_v11  ;;  %v36_v17 = vld [vmem:[#allocation3 + $0x48] sm:$0xff]  ;;  %v52_v18 = vmul.f32 %v44_v0, %v34_v13  ;;  %v37_v19 = vld [vmem:[#allocation3 + $0x50] sm:$0xff]  ;;  %p314_p8 = scmp.ne.s32.totalorder %s163_s1, %s313_s25  ;;  %p319_p10 = scmp.lt.s32.totalorder %s313_s25, %s313_s25 }
  0x17   :  { %261 = vtanh.f32 %v46_v5  ;;  %v53_v20 = vmul.f32 %v44_v0, %v35_v15  ;;  %v38_v21 = vld [vmem:[#allocation3 + $0x58] sm:$0xff]  ;;  %v54_v22 = vmul.f32 %v44_v0, %v36_v17  ;;  %v39_v23 = vld [vmem:[#allocation3 + $0x60] sm:$0xff]  ;;  %v55_v24 = vmul.f32 %v44_v0, %v37_v19  ;;  %v40_v25 = vld [vmem:[#allocation3 + $0x68] sm:$0xff] }
  0x18   :  { %263 = vtanh.f32 %v47_v7  ;;  %v56_v26 = vmul.f32 %v44_v0, %v38_v21  ;;  %v41_v27 = vld [vmem:[#allocation3 + $0x70] sm:$0xff]  ;;  %v57_v28 = vmul.f32 %v44_v0, %v39_v23  ;;  %v42_v29 = vld [vmem:[#allocation3 + $0x78] sm:$0xff]  ;;  %v58_v30 = vmul.f32 %v44_v0, %v40_v25  ;;  %p320_p11 = por %p319_p10, %p318_p9 }
  0x19   :  { %265 = vtanh.f32 %v48_v10  ;;  %v59_v32 = vmul.f32 %v44_v0, %v41_v27  ;;  %v60_v34 = vmul.f32 %v44_v0, %v42_v29 }
  0x1a   :  { %267 = vtanh.f32 %v49_v12  ;;  %p321_p12 = pnand %p320_p11, %p314_p8 }
  0x1b   :  { %269 = vtanh.f32 %v50_v14 }
  0x1c   :  { %271 = vtanh.f32 %v51_v16 }
  0x1d   :  { %273 = vtanh.f32 %v52_v18 }
  0x1e   :  { %275 = vtanh.f32 %v53_v20 }
  0x1f   :  { %277 = vtanh.f32 %v54_v22 }
  0x20   :  { %v260_v31 = vpop.eup %259  ;;  %279 = vtanh.f32 %v55_v24 }
  0x21   :  { %v262_v33 = vpop.eup %261  ;;  %281 = vtanh.f32 %v56_v26 }
  0x22   :  { %v264_v35 = vpop.eup %263  ;;  %v209_v36 = vpack.c.bf16 %v262_v33, %v260_v31  ;;  %283 = vtanh.f32 %v57_v28 }
  0x23   :  { %v266_v37 = vpop.eup %265  ;;  %285 = vtanh.f32 %v58_v30 }
  0x24   :  { %v268_v38 = vpop.eup %267  ;;  %210 = vst [vmem:[#allocation6] sm:$0xff] %v209_v36   ;;  %v214_v39 = vpack.c.bf16 %v266_v37, %v264_v35  ;;  %287 = vtanh.f32 %v59_v32 }
  0x25   :  { %v270_v40 = vpop.eup %269  ;;  %289 = vtanh.f32 %v60_v34 }
  0x26   :  { %v272_v41 = vpop.eup %271  ;;  %246 = vst [vmem:[#allocation6 + $0x8] sm:$0xff] %v214_v39   ;;  %v219_v42 = vpack.c.bf16 %v270_v40, %v268_v38 }
  0x27   :  { %v274_v43 = vpop.eup %273 }
  0x28   :  { %v276_v44 = vpop.eup %275  ;;  %247 = vst [vmem:[#allocation6 + $0x10] sm:$0xff] %v219_v42   ;;  %v224_v45 = vpack.c.bf16 %v274_v43, %v272_v41 }
  0x29   :  { %v278_v46 = vpop.eup %277 }
  0x2a   :  { %v280_v47 = vpop.eup %279  ;;  %248 = vst [vmem:[#allocation6 + $0x18] sm:$0xff] %v224_v45   ;;  %v229_v48 = vpack.c.bf16 %v278_v46, %v276_v44 }
  0x2b   :  { %v282_v49 = vpop.eup %281 }
  0x2c   :  { %v284_v50 = vpop.eup %283  ;;  %249 = vst [vmem:[#allocation6 + $0x20] sm:$0xff] %v229_v48   ;;  %v234_v51 = vpack.c.bf16 %v282_v49, %v280_v47 }
  0x2d   :  { %v286_v52 = vpop.eup %285 }
  0x2e   :  { %v288_v53 = vpop.eup %287  ;;  %250 = vst [vmem:[#allocation6 + $0x28] sm:$0xff] %v234_v51   ;;  %v239_v54 = vpack.c.bf16 %v286_v52, %v284_v50 }
  0x2f   :  { %v290_v55 = vpop.eup %289 }
  0x30   :  { %251 = vst [vmem:[#allocation6 + $0x30] sm:$0xff] %v239_v54   ;;  %v244_v56 = vpack.c.bf16 %v290_v55, %v288_v53 }
  0x32   :  { %252 = vst [vmem:[#allocation6 + $0x38] sm:$0xff] %v244_v56  }
  0x33   :  { %324 = shalt.err (!%p321_p12)
}
  0x34   :  { %s325_s28 = scalar_lea.hbm %s389_s2, 1024 }
  0x35   :  { %p326_p13 = scmp.ne.s32.totalorder %s389_s2, %s325_s28  ;;  %p329_p0 = scmp.lt.u32.totalorder %s325_s28, %s389_s2 }
  0x37   :  { %p331_p1 = pnand %p329_p0, %p326_p13 }
  0x39   :  { %334 = shalt.err (!%p331_p1)
}
  0x3a   :  { %s343_s5 = smov 64   ;;  %s344_s6 = smov 4  }
  0x3b   :  { %168 = dma.vmem_to_hbm [thread:$0]  %s163_s1, 1024, %s389_s2, [#allocation5], %s343_s5, %s343_s5, %s344_s6  }
  0x3c   :  { %337 = dma.done.wait [#allocation5], 1024  }
  0x3d   :  { %338 = vsyncadd [#allocation5], 4294966272 }
  0x3e   :  { %172 = vsyncpa [#allocation4], 1 }
  0x3f   :  { %173 = vsyncpa [#allocation5], 1 }

</bundles_post_ra>
